<compile_context>
chip_gen: v5e
topology: v5e:2x2
jax: 0.10.0
libtpu: 0.0.40
codegen_flags: <defaults>
</compile_context>

<pallas_src>
import functools

import jax
import jax.numpy as jnp
from jax import lax
from jax.experimental import pallas as pl
from jax.experimental.pallas import tpu as pltpu


EPS = 1e-6  # Llama4TextL2Norm default


# -----------------------------------------------------------------------------
# Pallas kernel
# -----------------------------------------------------------------------------
def _l2norm_kernel(x_ref, o_ref, *, eps, inv_h):
    # x_ref/o_ref: (block_rows, H). Rows are independent; reduce over lanes.
    #
    # Note on partial tail blocks: when M % block_rows != 0 the padded rows of
    # the last block contain garbage.  x*x >= 0 and eps > 0 keep rsqrt finite,
    # and the padded rows are masked out on the store, so this is benign.
    x = x_ref[...].astype(jnp.float32)
    ss = jnp.sum(x * x, axis=-1, keepdims=True)            # XLU cross-lane reduce
    ms = ss * inv_h                                         # single VALU scale
    o_ref[...] = (x * lax.rsqrt(ms + eps)).astype(o_ref.dtype)  # rsqrt -> EUP


def l2norm(x, eps=EPS, target_block_bytes=4 * 1024 * 1024):
    """Llama4TextL2Norm: x * rsqrt(mean(x^2, -1) + eps).

    Works for any leading shape; the last (normalized) dim should be a
    multiple of 128 for lane-dense stores (it is 128 for Llama4 qk-norm).
    """
    orig_shape = x.shape
    H = orig_shape[-1]
    x2d = x.reshape(-1, H)
    M = x2d.shape[0]

    itemsize = jnp.dtype(x.dtype).itemsize
    # Sub-32-bit dtypes pack along sublanes: min sublane tile is 8 (f32),
    # 16 (bf16/f16), 32 (int8/fp8).
    sublane = 8 * max(1, 4 // itemsize)

    # Biggest row block with ~target_block_bytes per buffer (amortizes the
    # ~0.35 us per-grid-step overhead to <10% of the HBM-streaming time).
    max_rows = (target_block_bytes // (H * itemsize)) // sublane * sublane
    max_rows = max(max_rows, sublane)

    if M <= max_rows:
        block_rows = M                      # full extent -> always legal
    else:
        block_rows = max_rows

    grid = (pl.cdiv(M, block_rows),)

    # VMEM budget: double-buffered input + output blocks, plus headroom for
    # the in-kernel f32 copy / intermediates, plus a small fixed margin.
    block_io_bytes = block_rows * H * itemsize
    block_f32_bytes = block_rows * H * 4
    vmem_budget = 2 * block_io_bytes + 2 * block_io_bytes \
        + 2 * block_f32_bytes + (4 << 20)
    vmem_budget = min(vmem_budget, 64 << 20)   # stay within v7x physical VMEM

    out2d = pl.pallas_call(
        functools.partial(_l2norm_kernel, eps=eps, inv_h=1.0 / H),
        out_shape=jax.ShapeDtypeStruct((M, H), x.dtype),
        grid=grid,
        in_specs=[pl.BlockSpec((block_rows, H), lambda i: (i, 0))],
        out_specs=pl.BlockSpec((block_rows, H), lambda i: (i, 0)),
        compiler_params=pltpu.CompilerParams(
            dimension_semantics=("parallel",),
            vmem_limit_bytes=int(vmem_budget),
        ),
    )(x2d)
    return out2d.reshape(orig_shape)


# -----------------------------------------------------------------------------
# Pure-JAX reference (for correctness check)
# -----------------------------------------------------------------------------
def reference_l2norm(x, eps=EPS):
    xf = x.astype(jnp.float32)
    y = xf * lax.rsqrt(jnp.mean(xf * xf, axis=-1, keepdims=True) + eps)
    return y.astype(x.dtype)


# -----------------------------------------------------------------------------
# Main
# -----------------------------------------------------------------------------
if __name__ == "__main__":
    # Shapes consistent with where Llama4TextL2Norm is used (qk-norm on
    # (batch, seq, num_heads, head_dim) tensors): head_dim = 128 (lane-dense).
    BATCH, SEQ, HEADS, HEAD_DIM = 2, 8, 4, 128

    key = jax.random.PRNGKey(0)
    x = jax.random.normal(key, (BATCH, SEQ, HEADS, HEAD_DIM), dtype=jnp.float32)

    out = l2norm(x)
    out = jax.block_until_ready(out)

    ref = reference_l2norm(x)
    assert out.shape == x.shape
    assert jnp.allclose(out, ref, rtol=1e-5, atol=1e-6), "L2 norm mismatch (f32)"

    # Also exercise the bf16 path (dtype-aware sublane rounding / sizing).
    xb = x.astype(jnp.bfloat16)
    outb = jax.block_until_ready(l2norm(xb))
    refb = reference_l2norm(xb)
    assert outb.dtype == jnp.bfloat16
    assert jnp.allclose(outb.astype(jnp.float32), refb.astype(jnp.float32),
                        rtol=2e-2, atol=2e-2), "L2 norm mismatch (bf16)"

    print("KERNEL_OK")
</pallas_src>

<mosaic_0001>
module attributes {stable_mosaic.version = 11 : i64} {
  func.func @_l2norm_kernel(%arg0: i32, %arg1: memref<64x128xf32, #tpu.memory_space<vmem>>, %arg2: memref<64x128xf32, #tpu.memory_space<vmem>>) attributes {dimension_semantics = [#tpu.dimension_semantics<parallel>], iteration_bounds = array<i64: 1>, scalar_prefetch = 0 : i64, scratch_operands = 0 : i64, tpu.core_type = #tpu.core_type<tc>, window_params = [{transform_indices = @transform_0, window_bounds = array<i64: 64, 128>}, {transform_indices = @transform_1, window_bounds = array<i64: 64, 128>}]} {
    %c0 = arith.constant 0 : index
    %c0_0 = arith.constant 0 : index
    %0 = vector.load %arg1[%c0, %c0_0] : memref<64x128xf32, #tpu.memory_space<vmem>>, vector<64x128xf32>
    %1 = arith.mulf %0, %0 : vector<64x128xf32>
    %cst = arith.constant dense<0.000000e+00> : vector<64xf32>
    %2 = vector.multi_reduction <add>, %1, %cst [1] : vector<64x128xf32> to vector<64xf32>
    %3 = vector.shape_cast %2 : vector<64xf32> to vector<64x1xf32>
    %cst_1 = arith.constant 7.812500e-03 : f32
    %4 = vector.broadcast %cst_1 : f32 to vector<64x1xf32>
    %5 = arith.mulf %3, %4 : vector<64x1xf32>
    %cst_2 = arith.constant 9.99999997E-7 : f32
    %6 = vector.broadcast %cst_2 : f32 to vector<64x1xf32>
    %7 = arith.addf %5, %6 : vector<64x1xf32>
    %8 = math.rsqrt %7 : vector<64x1xf32>
    %9 = vector.broadcast %8 : vector<64x1xf32> to vector<64x128xf32>
    %10 = arith.mulf %0, %9 : vector<64x128xf32>
    %c0_3 = arith.constant 0 : index
    %c0_4 = arith.constant 0 : index
    %11 = vector.load %arg2[%c0_3, %c0_4] : memref<64x128xf32, #tpu.memory_space<vmem>>, vector<64x128xf32>
    tpu.vector_store %arg2[%c0_3, %c0_4], %10 {strides = array<i32>} : memref<64x128xf32, #tpu.memory_space<vmem>>, vector<64x128xf32>,
    return
  }
  func.func @transform_0(%arg0: i32) -> (i32, i32) {
    %c0_i32 = arith.constant 0 : i32
    %c0_i32_0 = arith.constant 0 : i32
    return %arg0, %c0_i32 : i32, i32
  }
  func.func @transform_1(%arg0: i32) -> (i32, i32) {
    %c0_i32 = arith.constant 0 : i32
    %c0_i32_0 = arith.constant 0 : i32
    return %arg0, %c0_i32 : i32, i32
  }
}

</mosaic_0001>

<bundles_post_ra>
// kernel: tpu_custom_call.1
= control target key start
LH: loop header
LB: loop body
LE: loop exit
PB: predicated region body
PF: predicated region fallthrough
CT: control target
= control target key end

     0   :  { %6 = vsyncpa [#allocation3], 0  ;;  %s352_s0 = inlined_call_operand.hbm [shape: f32[64,128], index: 0, kind: input, shape index: {}]   ;;  %s353_s1 = inlined_call_operand.hbm [shape: f32[64,128], index: 1, kind: output, shape index: {}]  }
   0x1   :  { %7 = vsyncpa [#allocation4], 0  ;;  %s12_s8 = sshll.u32 %s352_s0, 4  ;;  %s260_s9 = smov [#allocation2]   ;;  %s13_s8 = int_to_ptr.hbm [resolvable:$true] %s12_s8 }
   0x2   :  { %s14_s10 = sshll.u32 %s260_s9, 4  ;;  %s261_s11 = smov 128   ;;  %s15_s10 = int_to_ptr.vmem [resolvable:$true] %s14_s10 }
   0x3   :  { %s262_s12 = smov 8  }
   0x4   :  { %20 = dma.hbm_to_vmem [thread:$0]  %s13_s8, 1024, %s15_s10, [#allocation3], %s261_s11, %s261_s11, %s262_s12  }
   0x5   :  { %256 = dma.done.wait [#allocation3], 1024  }
   0x6   :  { %257 = vsyncadd [#allocation3], 4294966272  ;;  %v280_v0 = vld [vmem:[#allocation2 + $0x20] sm:$0xff]  ;;  %v282_v1 = vld [vmem:[#allocation2 + $0x10] sm:$0xff]  ;;  %s263_s0 = smov [#allocation5]   ;;  %s175_s16 = sshll.u32 %s353_s1, 4  ;;  %s176_s16 = int_to_ptr.hbm [resolvable:$true] %s175_s16 }
   0x7   :  { %v284_v2 = vld [vmem:[#allocation2] sm:$0xff]  ;;  %v37_v3 = vmul.f32 %v280_v0, %v280_v0  ;;  %v35_v4 = vmul.f32 %v282_v1, %v282_v1  ;;  %v292_v6 = vld [vmem:[#allocation2 + $0x28] sm:$0xff]  ;;  %v294_v7 = vld [vmem:[#allocation2 + $0x18] sm:$0xff]  ;;  %s173_s13 = sshll.u32 %s263_s0, 4  ;;  %s174_s13 = int_to_ptr.vmem [resolvable:$true] %s173_s13 }
   0x8   :  { %v33_v5 = vmul.f32 %v284_v2, %v284_v2  ;;  %v296_v8 = vld [vmem:[#allocation2 + $0x8] sm:$0xff]  ;;  %v38_v9 = vmul.f32 %v292_v6, %v292_v6  ;;  %v36_v10 = vmul.f32 %v294_v7, %v294_v7  ;;  %v304_v12 = vld [vmem:[#allocation2 + $0x38] sm:$0xff]  ;;  %v306_v13 = vld [vmem:[#allocation2 + $0x30] sm:$0xff] }
   0x9   :  { %49 = vadd.xlane.f32.xlu2 %v37_v3  ;;  %45 = vadd.xlane.f32.xlu1 %v35_v4  ;;  %v34_v11 = vmul.f32 %v296_v8, %v296_v8  ;;  %v40_v14 = vmul.f32 %v304_v12, %v304_v12  ;;  %v39_v15 = vmul.f32 %v306_v13, %v306_v13 }
   0xa   :  { %41 = vadd.xlane.f32.xlu0 %v33_v5 }
  0x11   :  { %51 = vadd.xlane.f32.xlu2 %v38_v9  ;;  %47 = vadd.xlane.f32.xlu1 %v36_v10 }
  0x12   :  { %43 = vadd.xlane.f32.xlu0 %v34_v11 }
  0x19   :  { %55 = vadd.xlane.f32.xlu1 %v40_v14 }
  0x1a   :  { %53 = vadd.xlane.f32.xlu0 %v39_v15 }
  0x7c   :  { %v50_v16 = vpop.xlane.xlu2 %49  ;;  %v46_v17 = vpop.xlane.xlu1 %45 }
  0x7d   :  { %v61_v18 = vmul.f32 0.0078125, %v50_v16  ;;  %v59_v19 = vmul.f32 0.0078125, %v46_v17  ;;  %v42_v20 = vpop.xlane.xlu0 %41 }
  0x7e   :  { %v57_v21 = vmul.f32 0.0078125, %v42_v20 }
  0x7f   :  { %v69_v22 = vadd.f32 1e-06, %v61_v18  ;;  %v67_v23 = vadd.f32 1e-06, %v59_v19 }
  0x80   :  { %v65_v24 = vadd.f32 1e-06, %v57_v21 }
  0x81   :  { %192 = vrsqrt.f32 %v69_v22  ;;  %vm119_vm0 = vweird.f32 %v69_v22  ;;  %vm99_vm2 = vweird.f32 %v67_v23 }
  0x82   :  { %194 = vrsqrt.f32 %v67_v23  ;;  %vm79_vm4 = vweird.f32 %v65_v24 }
  0x83   :  { %196 = vrsqrt.f32 %v65_v24 }
  0x84   :  { %v52_v25 = vpop.xlane.xlu2 %51  ;;  %v48_v26 = vpop.xlane.xlu1 %47 }
  0x85   :  { %v62_v27 = vmul.f32 0.0078125, %v52_v25  ;;  %v60_v28 = vmul.f32 0.0078125, %v48_v26  ;;  %v44_v29 = vpop.xlane.xlu0 %43 }
  0x86   :  { %v58_v30 = vmul.f32 0.0078125, %v44_v29 }
  0x87   :  { %v193_v31 = vpop.eup %192  ;;  %v312_v32 = vadd.f32 1e-06, %v62_v27  ;;  %v314_v33 = vadd.f32 1e-06, %v60_v28 }
  0x88   :  { %v195_v34 = vpop.eup %194  ;;  %v114_v35 = vmul.f32 %v193_v31, %v69_v22  ;;  %v316_v36 = vadd.f32 1e-06, %v58_v30  ;;  %vm120_vm1 = vweird.f32 %v193_v31 }
  0x89   :  { %v197_v37 = vpop.eup %196  ;;  %v94_v38 = vmul.f32 %v195_v34, %v67_v23  ;;  %198 = vrsqrt.f32 %v312_v32  ;;  %vm100_vm3 = vweird.f32 %v195_v34  ;;  %vm121_vm6 = vmor %vm119_vm0, %vm120_vm1  ;;  %vm129_vm9 = vweird.f32 %v312_v32 }
  0x8a   :  { %v115_v39 = vmul.f32 %v193_v31, %v114_v35  ;;  %v74_v40 = vmul.f32 %v197_v37, %v65_v24  ;;  %200 = vrsqrt.f32 %v314_v33  ;;  %vm80_vm5 = vweird.f32 %v197_v37  ;;  %vm101_vm7 = vmor %vm99_vm2, %vm100_vm3 }
  0x8b   :  { %v95_v41 = vmul.f32 %v195_v34, %v94_v38  ;;  %202 = vrsqrt.f32 %v316_v36  ;;  %vm81_vm8 = vmor %vm79_vm4, %vm80_vm5  ;;  %vm109_vm14 = vweird.f32 %v314_v33  ;;  %vm89_vm0 = vweird.f32 %v316_v36 }
  0x8c   :  { %v116_v42 = vmul.f32 0.5, %v115_v39  ;;  %v75_v43 = vmul.f32 %v197_v37, %v74_v40  ;;  %v56_v44 = vpop.xlane.xlu1 %55 }
  0x8d   :  { %v96_v45 = vmul.f32 0.5, %v95_v41  ;;  %v64_v46 = vmul.f32 0.0078125, %v56_v44  ;;  %v54_v49 = vpop.xlane.xlu0 %53 }
  0x8e   :  { %v117_v47 = vsub.f32 1.5, %v116_v42  ;;  %v76_v48 = vmul.f32 0.5, %v75_v43  ;;  %v63_v60 = vmul.f32 0.0078125, %v54_v49 }
  0x8f   :  { %v199_v50 = vpop.eup %198  ;;  %v97_v51 = vsub.f32 1.5, %v96_v45  ;;  %v321_v52 = vadd.f32 1e-06, %v64_v46 }
  0x90   :  { %v201_v53 = vpop.eup %200  ;;  %v118_v54 = vmul.f32 %v193_v31, %v117_v47  ;;  %v77_v55 = vsub.f32 1.5, %v76_v48  ;;  %v124_v56 = vmul.f32 %v199_v50, %v312_v32  ;;  %v71_v18 = vadd.f32 1e-06, %v63_v60 }
  0x91   :  { %v203_v57 = vpop.eup %202  ;;  %v98_v58 = vmul.f32 %v195_v34, %v97_v51  ;;  %v104_v59 = vmul.f32 %v201_v53, %v314_v33  ;;  %204 = vrsqrt.f32 %v321_v52  ;;  %vm130_vm10 = vweird.f32 %v199_v50 }
  0x92   :  { %v122_v61 = vsel %vm121_vm6, %v193_v31, %v118_v54  ;;  %v78_v62 = vmul.f32 %v197_v37, %v77_v55  ;;  %v125_v63 = vmul.f32 %v199_v50, %v124_v56  ;;  %v84_v3 = vmul.f32 %v203_v57, %v316_v36  ;;  %vm131_vm13 = vmor %vm129_vm9, %vm130_vm10 }
  0x93   :  { %v157_v4 = vmul.f32 %v122_v61, %v280_v0  ;;  %v102_v5 = vsel %vm101_vm7, %v195_v34, %v98_v58  ;;  %v105_v9 = vmul.f32 %v201_v53, %v104_v59  ;;  %vm110_vm11 = vweird.f32 %v201_v53 }
  0x94   :  { %v155_v10 = vmul.f32 %v102_v5, %v282_v1  ;;  %v82_v11 = vsel %vm81_vm8, %v197_v37, %v78_v62  ;;  %v126_v14 = vmul.f32 0.5, %v125_v63  ;;  %v85_v15 = vmul.f32 %v203_v57, %v84_v3  ;;  %vm111_vm15 = vmor %vm109_vm14, %vm110_vm11 }
  0x95   :  { %165 = vst [vmem:[#allocation5 + $0x20] sm:$0xff] %v157_v4  ;;  %v153_v16 = vmul.f32 %v82_v11, %v284_v2  ;;  %v106_v17 = vmul.f32 0.5, %v105_v9  ;;  %206 = vrsqrt.f32 %v71_v18  ;;  %vm90_vm12 = vweird.f32 %v203_v57 }
  0x96   :  { %163 = vst [vmem:[#allocation5 + $0x10] sm:$0xff] %v155_v10  ;;  %v127_v19 = vsub.f32 1.5, %v126_v14  ;;  %v86_v0 = vmul.f32 0.5, %v85_v15  ;;  %vm91_vm1 = vmor %vm89_vm0, %vm90_vm12  ;;  %vm149_vm3 = vweird.f32 %v321_v52  ;;  %vm139_vm6 = vweird.f32 %v71_v18 }
  0x97   :  { %v205_v20 = vpop.eup %204  ;;  %161 = vst [vmem:[#allocation5] sm:$0xff] %v153_v16  ;;  %v107_v21 = vsub.f32 1.5, %v106_v17 }
  0x98   :  { %v128_v1 = vmul.f32 %v199_v50, %v127_v19  ;;  %v87_v22 = vsub.f32 1.5, %v86_v0  ;;  %v144_v23 = vmul.f32 %v205_v20, %v321_v52  ;;  %vm150_vm2 = vweird.f32 %v205_v20 }
  0x99   :  { %v108_v2 = vmul.f32 %v201_v53, %v107_v21  ;;  %vm151_vm4 = vmor %vm149_vm3, %vm150_vm2 }
  0x9a   :  { %v132_v24 = vsel %vm131_vm13, %v199_v50, %v128_v1  ;;  %v88_v25 = vmul.f32 %v203_v57, %v87_v22  ;;  %v145_v26 = vmul.f32 %v205_v20, %v144_v23 }
  0x9b   :  { %v158_v27 = vmul.f32 %v132_v24, %v292_v6  ;;  %v112_v28 = vsel %vm111_vm15, %v201_v53, %v108_v2  ;;  %v207_v32 = vpop.eup %206 }
  0x9c   :  { %v156_v29 = vmul.f32 %v112_v28, %v294_v7  ;;  %v92_v30 = vsel %vm91_vm1, %v203_v57, %v88_v25  ;;  %v146_v31 = vmul.f32 0.5, %v145_v26  ;;  %v134_v35 = vmul.f32 %v207_v32, %v71_v18 }
  0x9d   :  { %166 = vst [vmem:[#allocation5 + $0x28] sm:$0xff] %v158_v27  ;;  %v154_v34 = vmul.f32 %v92_v30, %v296_v8  ;;  %vm140_vm5 = vweird.f32 %v207_v32 }
  0x9e   :  { %164 = vst [vmem:[#allocation5 + $0x18] sm:$0xff] %v156_v29  ;;  %v147_v33 = vsub.f32 1.5, %v146_v31  ;;  %v135_v36 = vmul.f32 %v207_v32, %v134_v35  ;;  %vm141_vm7 = vmor %vm139_vm6, %vm140_vm5 }
  0x9f   :  { %162 = vst [vmem:[#allocation5 + $0x8] sm:$0xff] %v154_v34 }
  0xa0   :  { %v148_v37 = vmul.f32 %v205_v20, %v147_v33  ;;  %v136_v38 = vmul.f32 0.5, %v135_v36 }
  0xa2   :  { %v152_v6 = vsel %vm151_vm4, %v205_v20, %v148_v37  ;;  %v137_v39 = vsub.f32 1.5, %v136_v38 }
  0xa3   :  { %v160_v7 = vmul.f32 %v152_v6, %v304_v12 }
  0xa4   :  { %v138_v40 = vmul.f32 %v207_v32, %v137_v39 }
  0xa5   :  { %168 = vst [vmem:[#allocation5 + $0x38] sm:$0xff] %v160_v7 }
  0xa6   :  { %v142_v8 = vsel %vm141_vm7, %v207_v32, %v138_v40 }
  0xa7   :  { %v159_v41 = vmul.f32 %v142_v8, %v306_v13 }
  0xa9   :  { %167 = vst [vmem:[#allocation5 + $0x30] sm:$0xff] %v159_v41 }
  0xaa   :  { %181 = dma.vmem_to_hbm [thread:$0]  %s174_s13, 1024, %s176_s16, [#allocation4], %s261_s11, %s261_s11, %s262_s12  }
  0xab   :  { %258 = dma.done.wait [#allocation4], 1024  }
  0xac   :  { %259 = vsyncadd [#allocation4], 4294966272 }
  0xad   :  { %186 = vsyncpa [#allocation3], 1 }
  0xae   :  { %187 = vsyncpa [#allocation4], 1 }

</bundles_post_ra>
